<compile_context>
chip_gen: v6e
topology: v6e:2x2x1
jax: 0.10.0
libtpu: 0.0.40
codegen_flags: <defaults>
</compile_context>

<pallas_src>
import random

import jax
import jax.numpy as jnp
from jax.experimental import pallas as pl
from jax.experimental.pallas import tpu as pltpu


def _gain_scale_kernel(scale_ref, y_ref, o_ref):
    # scale_ref: SMEM (B,) f32  -- per-batch amplitude scale (scalar prefetch)
    # y_ref/o_ref: VMEM (1, TR, L) tile for batch b, row-tile r
    b = pl.program_id(0)
    scale = scale_ref[b].astype(o_ref.dtype)   # cast once; compute in native dtype
    o_ref[...] = y_ref[...] * scale


def _choose_tiling(M: int, itemsize: int):
    """Pick (L, R, TR, pad): row view (R, L) of a length-M row, block (TR, L)."""
    # Lane tile: largest multiple of 128 that divides M exactly (no padding);
    # otherwise pad M up to a multiple of 128 and use L = 128.
    pad = 0
    for L in (1024, 512, 256, 128):
        if M % L == 0:
            break
    else:
        L = 128
        pad = (-M) % L
    R = (M + pad) // L

    # Row tile: keep each block around <= 1 MiB so double-buffered in+out stays
    # inside every generation's scoped-VMEM budget (v5e 16 MiB default).
    max_rows = max(8, ((1 << 20) // (L * itemsize)) // 8 * 8)
    if R <= max_rows:
        TR = R                       # full second-to-last extent: always legal
    else:
        TR = max_rows                # multiple of 8; last tile may be ragged
        for cand in range(max_rows, 7, -8):
            if R % cand == 0:        # prefer an exact divisor (no masked edge)
                TR = cand
                break
    return L, R, TR, pad


def _gain_scale(y: jax.Array, amp_scales: jax.Array) -> jax.Array:
    """y: (B, S, C, T); amp_scales: (B,) f32. Returns y * amp_scales[:,None,None,None]."""
    B, S, C, T = y.shape
    M = S * C * T
    L, R, TR, pad = _choose_tiling(M, jnp.dtype(y.dtype).itemsize)

    y_flat = y.reshape(B, M)
    if pad:
        y_flat = jnp.pad(y_flat, ((0, 0), (0, pad)))
    y_view = y_flat.reshape(B, R, L)

    grid = (B, pl.cdiv(R, TR))
    out = pl.pallas_call(
        _gain_scale_kernel,
        out_shape=jax.ShapeDtypeStruct((B, R, L), y.dtype),
        grid_spec=pltpu.PrefetchScalarGridSpec(
            num_scalar_prefetch=1,               # amp_scales -> SMEM
            grid=grid,
            in_specs=[pl.BlockSpec((1, TR, L), lambda b, r, scales: (b, r, 0))],
            out_specs=pl.BlockSpec((1, TR, L), lambda b, r, scales: (b, r, 0)),
        ),
        input_output_aliases={1: 0},             # y_view (after amp_scales) -> out
        compiler_params=pltpu.CompilerParams(
            dimension_semantics=("parallel", "parallel"),
            vmem_limit_bytes=32 * 1024 * 1024,
        ),
    )(amp_scales.astype(jnp.float32), y_view)

    out_flat = out.reshape(B, R * L)
    if pad:
        out_flat = out_flat[:, :M]
    return out_flat.reshape(B, S, C, T)


class GainScale:
    """JAX/Pallas port of the PyTorch GainScale augmentation."""

    def __init__(self, p: float = 1.0, min_db: float = -10.0, max_db: float = 10.0):
        self.p = p
        self.min_db = min_db
        self.max_db = max_db
        self.training = True

    @staticmethod
    def db2amp(db):
        return 10.0 ** (db / 20.0)

    def __call__(self, y: jax.Array, key: jax.Array) -> jax.Array:
        B, S, C, T = y.shape
        # Host-side stochastic gate (matches torch `random.random() < p`).
        # TODO(synk): host RNG gate is not jit/pmap-traced; replicas may diverge.
        if self.training and random.random() < self.p:
            db_scales = jax.random.uniform(
                key, (B,), dtype=jnp.float32,
                minval=self.min_db, maxval=self.max_db,
            )
            amp_scales = self.db2amp(db_scales)   # (B,) f32
            return _gain_scale(y, amp_scales)
        return y


if __name__ == "__main__":
    random.seed(0)  # deterministic Bernoulli gate
    key = jax.random.PRNGKey(0)
    k_data, k_data2, k_scale = jax.random.split(key, 3)

    # --- direct kernel check (lane-aligned shape) ---
    B, S, C, T = 2, 8, 4, 16
    y = jax.random.normal(k_data, (B, S, C, T), dtype=jnp.float32)
    amp = jnp.array([0.5, 2.0], dtype=jnp.float32)
    out = jax.block_until_ready(_gain_scale(y, amp))
    ref = y * amp[:, None, None, None]
    assert out.shape == y.shape
    assert jnp.allclose(out, ref, atol=1e-6, rtol=1e-6)

    # --- direct kernel check (non-128-multiple M -> padding path) ---
    y2 = jax.random.normal(k_data2, (2, 3, 2, 25), dtype=jnp.float32)
    out2 = jax.block_until_ready(_gain_scale(y2, amp))
    ref2 = y2 * amp[:, None, None, None]
    assert jnp.allclose(out2, ref2, atol=1e-6, rtol=1e-6)

    # --- module-level check (random per-batch scale, constant within a batch) ---
    aug = GainScale(p=1.0, min_db=-10.0, max_db=10.0)
    out3 = jax.block_until_ready(aug(y, k_scale))
    ratio = (out3 / y).reshape(B, -1)
    assert out3.shape == y.shape
    assert jnp.allclose(ratio, ratio[:, :1], atol=1e-5)

    print("KERNEL_OK")
</pallas_src>

<mosaic_0001>
module attributes {stable_mosaic.version = 11 : i64} {
  func.func @_gain_scale_kernel(%arg0: i32, %arg1: i32, %arg2: memref<2xf32, #tpu.memory_space<smem>>, %arg3: memref<1x1x512xf32, #tpu.memory_space<vmem>>, %arg4: memref<1x1x512xf32, #tpu.memory_space<vmem>>) attributes {dimension_semantics = [#tpu.dimension_semantics<parallel>, #tpu.dimension_semantics<parallel>], iteration_bounds = array<i64: 2, 1>, scalar_prefetch = 1 : i64, scratch_operands = 0 : i64, tpu.core_type = #tpu.core_type<tc>, window_params = [{transform_indices = @transform_0, window_bounds = array<i64: 1, 1, 512>}, {transform_indices = @transform_1, window_bounds = array<i64: 1, 1, 512>}]} {
    %0 = arith.index_cast %arg0 : i32 to index
    %1 = memref.load %arg2[%0] : memref<2xf32, #tpu.memory_space<smem>>
    %c0 = arith.constant 0 : index
    %c0_0 = arith.constant 0 : index
    %c0_1 = arith.constant 0 : index
    %2 = vector.load %arg3[%c0, %c0_0, %c0_1] : memref<1x1x512xf32, #tpu.memory_space<vmem>>, vector<1x1x512xf32>
    %3 = vector.broadcast %1 : f32 to vector<1x1x512xf32>
    %4 = arith.mulf %2, %3 : vector<1x1x512xf32>
    %c0_2 = arith.constant 0 : index
    %c0_3 = arith.constant 0 : index
    %c0_4 = arith.constant 0 : index
    %5 = vector.load %arg4[%c0_2, %c0_3, %c0_4] : memref<1x1x512xf32, #tpu.memory_space<vmem>>, vector<1x1x512xf32>
    tpu.vector_store %arg4[%c0_2, %c0_3, %c0_4], %4 {strides = array<i32>} : memref<1x1x512xf32, #tpu.memory_space<vmem>>, vector<1x1x512xf32>,
    return
  }
  func.func @transform_0(%arg0: i32, %arg1: i32, %arg2: memref<2xf32, #tpu.memory_space<smem>>) -> (i32, i32, i32) {
    %c0_i32 = arith.constant 0 : i32
    %c0_i32_0 = arith.constant 0 : i32
    return %arg0, %arg1, %c0_i32 : i32, i32, i32
  }
  func.func @transform_1(%arg0: i32, %arg1: i32, %arg2: memref<2xf32, #tpu.memory_space<smem>>) -> (i32, i32, i32) {
    %c0_i32 = arith.constant 0 : i32
    %c0_i32_0 = arith.constant 0 : i32
    return %arg0, %arg1, %c0_i32 : i32, i32, i32
  }
}

</mosaic_0001>

<bundles_post_ra>
// kernel: tpu_custom_call.1
= control target key start
LH: loop header
LB: loop body
LE: loop exit
PB: predicated region body
PF: predicated region fallthrough
CT: control target
= control target key end

     0   :  { %s628_s0 = inlined_call_operand.vmem [shape: f32[2], index: 0, kind: input, shape index: {}]   ;;  %s629_s1 = inlined_call_operand.hbm [shape: f32[2,1,512], index: 1, kind: input, shape index: {}, may-alias: {1,2}]   ;;  %s630_s2 = inlined_call_operand.hbm [shape: f32[2,1,512], index: 2, kind: output, shape index: {}, may-alias: {1,2}]  }
   0x1   :  { %s7_s11 = sshll.u32 %s628_s0, 4  ;;  %s8_s11 = int_to_ptr.vmem [resolvable:$true] %s7_s11 }
   0x2   :  { %s348_s12 = scalar_lea.vmem %s8_s11, 16  ;;  %p353_p1 = scmp.lt.s32.totalorder %s8_s11, %s8_s11 }
   0x3   :  { %p349_p0 = scmp.ne.s32.totalorder %s8_s11, %s348_s12  ;;  %p354_p2 = scmp.lt.s32.totalorder %s348_s12, %s348_s12 }
   0x5   :  { %p355_p3 = por %p354_p2, %p353_p1 }
   0x7   :  { %p356_p4 = pnand %p355_p3, %p349_p0 }
   0x9   :  { %359 = shalt.err (!%p356_p4)  }
   0xa   :  { %s472_s13 = smov [#allocation3]  }
   0xb   :  { %10 = dma.vmem_to_smem %s8_s11, 16, %s472_s13, [#allocation2] }
   0xc   :  { %438 = dma.done.wait [#allocation2], 16 }
   0xd   :  { %439 = vsyncadd [#allocation2], 4294967280 }
   0xe   :  { %12 = sfence }
   0xf   :  { %13 = vsyncpa [#allocation5], 0 }
  0x10   :  { %15 = vsyncpa [#allocation5 + $0x1], 0 }
  0x11   :  { %16 = vsyncpa [#allocation6], 0 }
  0x12   :  { %18 = vsyncpa [#allocation6 + $0x1], 0  ;;  %s493_s14 = smov 0   ;;  %s495_s0 = smov 0  }
  0x13   :  { %s497_s15 = smov 0   ;;  %s499_s16 = smov 0  }
  0x14   :  { %s501_s17 = smov 0   ;;  %s503_s18 = smov 0  }
  0x15 LB: > { %s268_s19 = sadd.s32 4294967295, %s470_s18   ;;  %s269_s20 = sadd.s32 4294967294, %s470_s18   ;;  %s470_s18 = sphi %s503_s18, %s24_s18   ;;  %s466_s17 = sphi %s501_s17, %s642_s17   ;;  %s462_s16 = sphi %s499_s16, %s641_s16   ;;  %s458_s15 = sphi %s497_s15, %s640_s15   ;;  %s454_s0 = sphi %s495_s0, %s639_s0   ;;  %s450_s14 = sphi %s493_s14, %s638_s14  }
  0x16   : > { %s36_s21 = sadd.s32 1, %s466_s17  ;;  %s45_s22 = sadd.s32 1, %s458_s15 }
  0x17   : > { %p38_p5 = scmp.ge.s32.totalorder %s36_s21, 2  ;;  %p52_p6 = scmp.ne.s32.totalorder %s458_s15, %s454_s0 }
  0x18   : > { %p53_p7 = scmp.eq.s32.totalorder %s470_s18, 0  ;;  %p58_p8 = scmp.ne.s32.totalorder %s454_s0, %s450_s14 }
  0x19   : > { %s644_s21 = smov (%p38_p5, %s36_s21), 0  ;;  %p59_p10 = scmp.eq.s32.totalorder %s268_s19, 0 }
  0x1a   : > { %p534_p9 = por %p53_p7, %p52_p6  ;;  %s40_s24 = ssub.s32 %s466_s17, %s644_s21 }
  0x1b   : > { %p84_p11 = scmp.eq.s32.totalorder %s268_s19, 1  ;;  %p43_p12 = scmp.eq.s32.totalorder %s40_s24, 0 }
  0x1c   : > { %p540_p13 = por %p59_p10, %p58_p8  ;;  %p90_p1 = scmp.eq.s32.totalorder %s269_s20, 1 }
  0x1d   : > { %p544_p0 = por %p84_p11, %p52_p6  ;;  %p297_p4 = scmp.lt.s32.totalorder %s470_s18, 2 }
  0x1e   : > { %s549_s27 = scalar_select %p43_p12, %s458_s15, %s45_s22  }
  0x1f   : > { %p551_p2 = por %p90_p1, %p58_p8  ;;  %s110_s29 = sand.u32 1, %s458_s15  }
  0x20   : > { %s272_s30 = sshll.u32 %s110_s29, 2  ;;  %s283_s3 = sshll.u32 %s466_s17, 6 }
  0x21   : > { %s634_s28 = scalar_select %p551_p2, 1, 0 }
  0x22   : > { %s122_s6 = scalar_lea.hbm %s629_s1, %s283_s3  ;;  %s114_s7 = scalar_lea.vmem [#allocation4], %s272_s30 }
  0x23   : > { %s124_s8 = sshll.u32 %s114_s7, 4  ;;  %p564_p5 = pnand %p297_p4, %p534_p9  ;;  %s125_s8 = int_to_ptr.vmem [resolvable:$true] %s124_s8 }
  0x24   : > { %p275_p6 = scmp.ge.s32.totalorder %s470_s18, 1  ;;  %p129_p7 = scmp.lt.s32.totalorder %s470_s18, 3 }
  0x25   : > { %s111_s10 = scalar_lea.sflag [#allocation5], %s110_s29  ;;  %p362_p8 = pneg %p564_p5 }
  0x26   : > { %s373_s11 = scalar_lea.vmem %s125_s8, 64  ;;  %s473_s12 = smov [#allocation4]  }
  0x27   : > { %p374_p10 = scmp.ne.s32.totalorder %s125_s8, %s373_s11  ;;  %s378_s13 = sshll.u32 %s473_s12, 4  ;;  %s379_s13 = int_to_ptr.vmem [resolvable:$false] %s378_s13 }
  0x28   : > { %s380_s19 = scalar_lea.vmem %s379_s13, 128  ;;  %p381_p1 = scmp.lt.s32.totalorder %s125_s8, %s379_s13 }
  0x29   : > { %p376_p11 = pnand %p374_p10, %p362_p8  ;;  %p382_p3 = scmp.lt.s32.totalorder %s380_s19, %s373_s11 }
  0x2b   : > { %p377_p12 = pneg %p376_p11  ;;  %p383_p9 = por %p382_p3, %p381_p1 }
  0x2d   : > { %p384_p4 = pnand %p383_p9, %p377_p12 }
  0x2f   : > { %387 = shalt.err (!%p384_p4)
}
  0x30   : > { %292 = dma.hbm_to_vmem [thread:$0]  (!%p564_p5), %s122_s6, 64, %s125_s8, %s111_s10  }
  0x31   : > { %p130_p2 = pnand %p275_p6, %p129_p7 }
  0x32   : > { %s579_s20 = sand.u32 (!%p130_p2), 1, %s454_s0  }
  0x33   : > { %133 = sbr.rel (%p130_p2) target bundleno = 81 (0x51), region = 24  ;;  %s276_s22 = sshll.u32 (!%p130_p2), %s579_s20, 2 }
  0x34   : > { %s136_s23 = scalar_lea.sflag (!%p130_p2), [#allocation5], %s579_s20  ;;  %s139_s24 = scalar_lea.vmem (!%p130_p2), [#allocation4], %s276_s22 }
  0x38   : > { %441 = dma.done.wait (%p540_p13), %s136_s23, 64  }
  0x39   : > { %443 = vsyncadd (%p540_p13), %s136_s23, 4294967232  ;;  %s158_s29 = sld [smem:[#allocation3 + %s462_s16]]  ;;  %v162_v0 = vlaneseq  ;;  %s157_s30 = scalar_lea.vmem [#allocation7], %s276_s22  ;;  %v159_v1 = vld [vmem:[%s139_s24] sm:$0xf] }
  0x3a   : > { %s184_s3 = sshll.u32 %s157_s30, 4  ;;  %s284_s4 = sshll.u32 %s462_s16, 6  ;;  %s185_s3 = int_to_ptr.vmem [resolvable:$true] %s184_s3 }
  0x3b   : > { %vm164_vm0 = vcmp.lt.s32.totalorder %v162_v0, 512  ;;  %s182_s7 = scalar_lea.hbm %s630_s2, %s284_s4  ;;  %s168_s25 = scalar_lea.sflag [#allocation6], %s579_s20 }
  0x3c   : > { %s388_s8 = scalar_lea.vmem %s185_s3, 64  ;;  %s474_s9 = smov [#allocation7]  }
  0x3d   : > { %p389_p13 = scmp.ne.s32.totalorder %s185_s3, %s388_s8  ;;  %s392_s10 = sshll.u32 %s474_s9, 4  ;;  %s393_s10 = int_to_ptr.vmem [resolvable:$false] %s392_s10 }
  0x3e   : > { %s394_s16 = scalar_lea.vmem %s393_s10, 128  ;;  %p395_p5 = scmp.lt.s32.totalorder %s185_s3, %s393_s10 }
  0x3f   : > { %v160_v2 = vstv %s158_s29  ;;  %p390_p2 = pnand %p389_p13, %p544_p0  ;;  %p396_p6 = scmp.lt.s32.totalorder %s394_s16, %s388_s8 }
  0x40   : > { %v161_v3 = vmul.f32 %v160_v2, %v159_v1 }
  0x41   : > { %p391_p3 = pneg %p390_p2  ;;  %p397_p7 = por %p396_p6, %p395_p5 }
  0x42   : > { %166 = vst.msk [vmem:[%s157_s30] sm:$0xf] %vm164_vm0, %v161_v3 }
  0x43   : > { %p398_p8 = pnand %p397_p7, %p391_p3 }
  0x45   : > { %401 = shalt.err (!%p398_p8)
}
  0x46   : > { %s402_s11 = scalar_lea.hbm %s182_s7, 64  ;;  %s406_s19 = scalar_lea.hbm %s630_s2, 128 }
  0x47   : > { %p403_p10 = scmp.ne.s32.totalorder %s182_s7, %s402_s11  ;;  %p407_p1 = scmp.lt.s32.totalorder %s182_s7, %s630_s2 }
  0x48   : > { %p408_p9 = scmp.lt.s32.totalorder %s406_s19, %s402_s11 }
  0x49   : > { %p404_p11 = pnand %p403_p10, %p544_p0 }
  0x4a   : > { %p409_p4 = por %p408_p9, %p407_p1 }
  0x4b   : > { %p405_p12 = pneg %p404_p11 }
  0x4d   : > { %p410_p13 = pnand %p409_p4, %p405_p12 }
  0x4f   : > { %413 = shalt.err (!%p410_p13)
}
  0x50   : > { %287 = dma.vmem_to_hbm [thread:$0]  (%p544_p0), %s185_s3, 64, %s182_s7, %s168_s25  }
  0x51 PF: > { %s196_s23 = sand.u32 1, %s450_s14   ;;  %p636_p2 = scmp.ne.s32.totalorder %s634_s28, 0 }
  0x52   : > { %p637_p3 = scmp.ge.s32.totalorder %s470_s18, 2  ;;  %s197_s24 = scalar_lea.sflag [#allocation6], %s196_s23 }
  0x54   : > { %p294_p5 = pnand %p637_p3, %p636_p2 }
  0x56   : > { %p295_p6 = pneg %p294_p5 }
  0x58   : > { %445 = dma.done.wait (%p295_p6), %s197_s24, 64  }
  0x59   : > { %447 = vsyncadd (%p295_p6), %s197_s24, 4294967232  ;;  %s24_s18 = sadd.s32 1, %s470_s18   ;;  %s638_s14 = smov %s454_s0 }
  0x5a   : > { %p21_p7 = scmp.ge.s32.totalorder %s24_s18, 4   ;;  %s639_s0 = smov %s458_s15 }
  0x5b   : > { %s640_s15 = smov %s549_s27  ;;  %s641_s16 = smov %s466_s17 }
  0x5c   : > { %s642_s17 = smov %s644_s21  ;;  %23 = sbr.rel (!%p21_p7) target bundleno = 21 (0x15), region = 69 }
  0x61   :  { %202 = vsyncpa [#allocation5], 1 }
  0x62   :  { %204 = vsyncpa [#allocation5 + $0x1], 1 }
  0x63   :  { %205 = vsyncpa [#allocation6], 1 }
  0x64   :  { %207 = vsyncpa [#allocation6 + $0x1], 1 }

</bundles_post_ra>
